<compile_context>
chip_gen: v7x
topology: tpu7x:2x2x1
jax: 0.10.0
libtpu: 0.0.40
codegen_flags: <defaults>
</compile_context>

<pallas_src>
import functools
import math

import jax
import jax.numpy as jnp
from jax.experimental import pallas as pl
from jax.experimental.pallas import tpu as pltpu


ROW_TILE = 512       # max rows per grid step (multiple of 256; sweep 512/1024 on v6e)
MIN_ROW_TILE = 256   # tile granularity once the grid has > 1 step (128 suffices on v5e)


def _round_up(x, m):
    return (x + m - 1) // m * m


def _cdiv(a, b):
    return -(-a // b)


def _choose_row_tile(m):
    """Pick (tm, grid) for the row axis.

    Small m -> a single block covering all rows (block dim == full dim is legal).
    Large m -> tm is a multiple of 256, capped at ROW_TILE, and chosen so the
    grid has >= 2 steps (so "parallel" can shard rows across v7x's 2 TCs); the
    last block may be ragged (Pallas masks the tail) instead of rounding m up.
    """
    if m <= MIN_ROW_TILE:
        return m, 1
    tm = min(ROW_TILE, max(MIN_ROW_TILE, _round_up(_cdiv(m, 2), MIN_ROW_TILE)))
    return tm, _cdiv(m, tm)


# ----------------------------------------------------------------------------
# Pallas kernel: the full MLP stack for one row-tile.
#   refs = (x_ref, w0, b0, w1, b1, ..., o_ref)
#   x_ref : (tm, in_dim)            activation tile (unpadded feature width)
#   w_i   : (in_i, out_i)           natural-shape weight, layout (in, out)
#   b_i   : (1, out_i)              bias (kept f32, added after f32 accumulation)
#   o_ref : (tm, out_dim)           output tile (exact width, no padding)
# The running activation `h` stays in vregs/VMEM; matmuls accumulate in f32
# (preferred_element_type) regardless of the operand/compute dtype.
# ----------------------------------------------------------------------------
def _fused_mlp_kernel(*refs, num_layers):
    x_ref, o_ref = refs[0], refs[-1]
    h = x_ref[...]
    compute_dtype = h.dtype
    for i in range(num_layers):  # static Python loop -> fully unrolled (L=3)
        w_ref = refs[1 + 2 * i]
        b_ref = refs[2 + 2 * i]
        h = jnp.dot(h, w_ref[...], preferred_element_type=jnp.float32)
        h = h + b_ref[...].astype(jnp.float32)
        if i < num_layers - 1:
            h = jnp.maximum(h, 0.0).astype(compute_dtype)  # ReLU, back to MXU dtype
    o_ref[...] = h.astype(o_ref.dtype)


def fused_mlp_pallas(x, weights, biases, *, compute_dtype=None, out_dtype=None):
    """x: (..., in_dim) -> (..., out_dim); one pallas_call for the whole MLP."""
    compute_dtype = compute_dtype or x.dtype
    out_dtype = out_dtype or x.dtype

    lead = x.shape[:-1]
    x2 = x.reshape(-1, x.shape[-1]).astype(compute_dtype)
    M, K = x2.shape
    num_layers = len(weights)
    assert K == weights[0].shape[0], (K, weights[0].shape)
    out_dim = weights[-1].shape[1]

    tm, grid_m = _choose_row_tile(M)

    # Operands: unpadded activations + per-layer natural-shape weights/biases.
    operands = [x2]
    wb_shapes = []
    for w, b in zip(weights, biases):
        w = w.astype(compute_dtype)                    # bf16 weights at production dims
        b = b.reshape(1, -1).astype(jnp.float32)       # bias added after f32 accumulation
        operands += [w, b]
        wb_shapes += [w.shape, b.shape]

    kernel = functools.partial(_fused_mlp_kernel, num_layers=num_layers)

    def build(single_buffer_weights):
        def resident(shape):
            # Grid-invariant block: resident in VMEM across all row tiles.
            idx = lambda i: (0,) * len(shape)
            if single_buffer_weights:
                return pl.BlockSpec(shape, idx, pipeline_mode=pl.Buffered(1))
            return pl.BlockSpec(shape, idx)

        in_specs = [pl.BlockSpec((tm, K), lambda i: (i, 0))]  # rows tiled; K = full dim
        in_specs += [resident(s) for s in wb_shapes]

        return pl.pallas_call(
            kernel,
            out_shape=jax.ShapeDtypeStruct((M, out_dim), out_dtype),
            grid=(grid_m,),
            in_specs=in_specs,
            out_specs=pl.BlockSpec((tm, out_dim), lambda i: (i, 0)),
            compiler_params=pltpu.CompilerParams(
                dimension_semantics=("parallel",),  # row tiles are independent
            ),
        )

    try:
        out = build(single_buffer_weights=True)(*operands)
    except Exception:  # pragma: no cover - fallback if Buffered(1) is unsupported
        out = build(single_buffer_weights=False)(*operands)

    return out.reshape(lead + (out_dim,))


# ----------------------------------------------------------------------------
# Parameter construction (PyTorch nn.Linear-style uniform init), stored at
# natural shapes in (in_features, out_features) layout so the kernel computes
# x @ W.  The same lists feed both the kernel and the plain-JAX reference.
# ----------------------------------------------------------------------------
def init_mlp_params(key, input_dim, hidden_dim, output_dim, num_layers):
    h = [hidden_dim] * (num_layers - 1)
    in_dims = [input_dim] + h
    out_dims = h + [output_dim]
    weights, biases = [], []
    for n_in, n_out in zip(in_dims, out_dims):
        key, kw, kb = jax.random.split(key, 3)
        bound = 1.0 / math.sqrt(n_in)
        weights.append(jax.random.uniform(kw, (n_in, n_out), jnp.float32, -bound, bound))
        biases.append(jax.random.uniform(kb, (n_out,), jnp.float32, -bound, bound))
    return weights, biases


def mlp_reference(x, weights, biases):
    """Plain-JAX reference matching the PyTorch MLP forward."""
    num_layers = len(weights)
    for i, (w, b) in enumerate(zip(weights, biases)):
        x = x @ w + b
        if i < num_layers - 1:
            x = jax.nn.relu(x)
    return x


if __name__ == "__main__":
    key = jax.random.PRNGKey(0)
    k_x, k_p = jax.random.split(key)

    # Small shapes consistent with TransformerPredictor.mask_embed:
    #   hs slice of shape (batch, num_queries, hidden_dim) -> MLP(hidden, hidden, mask_dim, 3)
    batch, num_queries = 2, 8
    hidden_dim, mask_dim, num_layers = 32, 16, 3

    x = jax.random.normal(k_x, (batch, num_queries, hidden_dim), dtype=jnp.float32)
    weights, biases = init_mlp_params(k_p, hidden_dim, hidden_dim, mask_dim, num_layers)
    ref = mlp_reference(x, weights, biases)

    # f32 path (primary correctness gate, tight tolerance).
    out = jax.block_until_ready(fused_mlp_pallas(x, weights, biases))
    assert out.shape == (batch, num_queries, mask_dim), out.shape
    err = float(jnp.max(jnp.abs(out - ref)))
    assert jnp.allclose(out, ref, atol=1e-4, rtol=1e-4), (
        "f32 mismatch vs reference: max abs err = %e" % err
    )

    # bf16 operands + f32 MXU accumulation (the production dtype on v5e/v6e/v7x).
    out_bf16 = jax.block_until_ready(
        fused_mlp_pallas(x, weights, biases,
                         compute_dtype=jnp.bfloat16, out_dtype=jnp.float32))
    err_bf16 = float(jnp.max(jnp.abs(out_bf16 - ref)))
    assert jnp.allclose(out_bf16, ref, atol=5e-2, rtol=5e-2), (
        "bf16 mismatch vs reference: max abs err = %e" % err_bf16
    )

    print("KERNEL_OK")
</pallas_src>

<mosaic_0001>
module attributes {stable_mosaic.version = 11 : i64} {
  func.func @_fused_mlp_kernel(%arg0: i32, %arg1: memref<16x32xf32, #tpu.memory_space<vmem>>, %arg2: memref<32x32xf32, #tpu.memory_space<vmem>>, %arg3: memref<1x32xf32, #tpu.memory_space<vmem>>, %arg4: memref<32x32xf32, #tpu.memory_space<vmem>>, %arg5: memref<1x32xf32, #tpu.memory_space<vmem>>, %arg6: memref<32x16xf32, #tpu.memory_space<vmem>>, %arg7: memref<1x16xf32, #tpu.memory_space<vmem>>, %arg8: memref<16x16xf32, #tpu.memory_space<vmem>>) attributes {dimension_semantics = [#tpu.dimension_semantics<parallel>], iteration_bounds = array<i64: 1>, scalar_prefetch = 0 : i64, scratch_operands = 0 : i64, tpu.core_type = #tpu.core_type<tc>, window_params = [{transform_indices = @transform_0, window_bounds = array<i64: 16, 32>}, {pipeline_mode = #tpu.pipeline_mode<synchronous>, transform_indices = @transform_1, window_bounds = array<i64: 32, 32>}, {pipeline_mode = #tpu.pipeline_mode<synchronous>, transform_indices = @transform_2, window_bounds = array<i64: 1, 32>}, {pipeline_mode = #tpu.pipeline_mode<synchronous>, transform_indices = @transform_3, window_bounds = array<i64: 32, 32>}, {pipeline_mode = #tpu.pipeline_mode<synchronous>, transform_indices = @transform_4, window_bounds = array<i64: 1, 32>}, {pipeline_mode = #tpu.pipeline_mode<synchronous>, transform_indices = @transform_5, window_bounds = array<i64: 32, 16>}, {pipeline_mode = #tpu.pipeline_mode<synchronous>, transform_indices = @transform_6, window_bounds = array<i64: 1, 16>}, {transform_indices = @transform_7, window_bounds = array<i64: 16, 16>}]} {
    %c0 = arith.constant 0 : index
    %c0_0 = arith.constant 0 : index
    %0 = vector.load %arg1[%c0, %c0_0] : memref<16x32xf32, #tpu.memory_space<vmem>>, vector<16x32xf32>
    %c0_1 = arith.constant 0 : index
    %c0_2 = arith.constant 0 : index
    %1 = vector.load %arg2[%c0_1, %c0_2] : memref<32x32xf32, #tpu.memory_space<vmem>>, vector<32x32xf32>
    %cst = arith.constant dense<0.000000e+00> : vector<16x32xf32>
    %2 = tpu.matmul %0, %1, %cst {dimension_numbers = #tpu.dot_dimension_numbers<[1], [0], [0], [1], [0, 0, 1, 1], [], []>} : vector<16x32xf32>, vector<32x32xf32>, vector<16x32xf32> -> vector<16x32xf32>
    %c0_3 = arith.constant 0 : index
    %c0_4 = arith.constant 0 : index
    %3 = vector.load %arg3[%c0_3, %c0_4] : memref<1x32xf32, #tpu.memory_space<vmem>>, vector<1x32xf32>
    %4 = vector.broadcast %3 : vector<1x32xf32> to vector<16x32xf32>
    %5 = arith.addf %2, %4 : vector<16x32xf32>
    %cst_5 = arith.constant 0.000000e+00 : f32
    %6 = vector.broadcast %cst_5 : f32 to vector<16x32xf32>
    %7 = arith.maximumf %5, %6 : vector<16x32xf32>
    %c0_6 = arith.constant 0 : index
    %c0_7 = arith.constant 0 : index
    %8 = vector.load %arg4[%c0_6, %c0_7] : memref<32x32xf32, #tpu.memory_space<vmem>>, vector<32x32xf32>
    %cst_8 = arith.constant dense<0.000000e+00> : vector<16x32xf32>
    %9 = tpu.matmul %7, %8, %cst_8 {dimension_numbers = #tpu.dot_dimension_numbers<[1], [0], [0], [1], [0, 0, 1, 1], [], []>} : vector<16x32xf32>, vector<32x32xf32>, vector<16x32xf32> -> vector<16x32xf32>
    %c0_9 = arith.constant 0 : index
    %c0_10 = arith.constant 0 : index
    %10 = vector.load %arg5[%c0_9, %c0_10] : memref<1x32xf32, #tpu.memory_space<vmem>>, vector<1x32xf32>
    %11 = vector.broadcast %10 : vector<1x32xf32> to vector<16x32xf32>
    %12 = arith.addf %9, %11 : vector<16x32xf32>
    %cst_11 = arith.constant 0.000000e+00 : f32
    %13 = vector.broadcast %cst_11 : f32 to vector<16x32xf32>
    %14 = arith.maximumf %12, %13 : vector<16x32xf32>
    %c0_12 = arith.constant 0 : index
    %c0_13 = arith.constant 0 : index
    %15 = vector.load %arg6[%c0_12, %c0_13] : memref<32x16xf32, #tpu.memory_space<vmem>>, vector<32x16xf32>
    %cst_14 = arith.constant dense<0.000000e+00> : vector<16x16xf32>
    %16 = tpu.matmul %14, %15, %cst_14 {dimension_numbers = #tpu.dot_dimension_numbers<[1], [0], [0], [1], [0, 0, 1, 1], [], []>} : vector<16x32xf32>, vector<32x16xf32>, vector<16x16xf32> -> vector<16x16xf32>
    %c0_15 = arith.constant 0 : index
    %c0_16 = arith.constant 0 : index
    %17 = vector.load %arg7[%c0_15, %c0_16] : memref<1x16xf32, #tpu.memory_space<vmem>>, vector<1x16xf32>
    %18 = vector.broadcast %17 : vector<1x16xf32> to vector<16x16xf32>
    %19 = arith.addf %16, %18 : vector<16x16xf32>
    %c0_17 = arith.constant 0 : index
    %c0_18 = arith.constant 0 : index
    %20 = vector.load %arg8[%c0_17, %c0_18] : memref<16x16xf32, #tpu.memory_space<vmem>>, vector<16x16xf32>
    tpu.vector_store %arg8[%c0_17, %c0_18], %19 {strides = array<i32>} : memref<16x16xf32, #tpu.memory_space<vmem>>, vector<16x16xf32>,
    return
  }
  func.func @transform_0(%arg0: i32) -> (i32, i32) {
    %c0_i32 = arith.constant 0 : i32
    %c0_i32_0 = arith.constant 0 : i32
    return %arg0, %c0_i32 : i32, i32
  }
  func.func @transform_1(%arg0: i32) -> (i32, i32) {
    %c0_i32 = arith.constant 0 : i32
    %c0_i32_0 = arith.constant 0 : i32
    %c0_i32_1 = arith.constant 0 : i32
    return %c0_i32, %c0_i32_0 : i32, i32
  }
  func.func @transform_2(%arg0: i32) -> (i32, i32) {
    %c0_i32 = arith.constant 0 : i32
    %c0_i32_0 = arith.constant 0 : i32
    %c0_i32_1 = arith.constant 0 : i32
    return %c0_i32, %c0_i32_0 : i32, i32
  }
  func.func @transform_3(%arg0: i32) -> (i32, i32) {
    %c0_i32 = arith.constant 0 : i32
    %c0_i32_0 = arith.constant 0 : i32
    %c0_i32_1 = arith.constant 0 : i32
    return %c0_i32, %c0_i32_0 : i32, i32
  }
  func.func @transform_4(%arg0: i32) -> (i32, i32) {
    %c0_i32 = arith.constant 0 : i32
    %c0_i32_0 = arith.constant 0 : i32
    %c0_i32_1 = arith.constant 0 : i32
    return %c0_i32, %c0_i32_0 : i32, i32
  }
  func.func @transform_5(%arg0: i32) -> (i32, i32) {
    %c0_i32 = arith.constant 0 : i32
    %c0_i32_0 = arith.constant 0 : i32
    %c0_i32_1 = arith.constant 0 : i32
    return %c0_i32, %c0_i32_0 : i32, i32
  }
  func.func @transform_6(%arg0: i32) -> (i32, i32) {
    %c0_i32 = arith.constant 0 : i32
    %c0_i32_0 = arith.constant 0 : i32
    %c0_i32_1 = arith.constant 0 : i32
    return %c0_i32, %c0_i32_0 : i32, i32
  }
  func.func @transform_7(%arg0: i32) -> (i32, i32) {
    %c0_i32 = arith.constant 0 : i32
    %c0_i32_0 = arith.constant 0 : i32
    return %arg0, %c0_i32 : i32, i32
  }
}

module attributes {stable_mosaic.version = 11 : i64} {
  func.func @_fused_mlp_kernel(%arg0: i32, %arg1: memref<16x32xf32, #tpu.memory_space<vmem>>, %arg2: memref<32x32xf32, #tpu.memory_space<vmem>>, %arg3: memref<1x32xf32, #tpu.memory_space<vmem>>, %arg4: memref<32x32xf32, #tpu.memory_space<vmem>>, %arg5: memref<1x32xf32, #tpu.memory_space<vmem>>, %arg6: memref<32x16xf32, #tpu.memory_space<vmem>>, %arg7: memref<1x16xf32, #tpu.memory_space<vmem>>, %arg8: memref<16x16xf32, #tpu.memory_space<vmem>>) attributes {dimension_semantics = [#tpu.dimension_semantics<parallel>], iteration_bounds = array<i64: 1>, scalar_prefetch = 0 : i64, scratch_operands = 0 : i64, tpu.core_type = #tpu.core_type<tc>, window_params = [{transform_indices = @transform_0, window_bounds = array<i64: 16, 32>}, {pipeline_mode = #tpu.pipeline_mode<synchronous>, transform_indices = @transform_1, window_bounds = array<i64: 32, 32>}, {pipeline_mode = #tpu.pipeline_mode<synchronous>, transform_indices = @transform_2, window_bounds = array<i64: 1, 32>}, {pipeline_mode = #tpu.pipeline_mode<synchronous>, transform_indices = @transform_3, window_bounds = array<i64: 32, 32>}, {pipeline_mode = #tpu.pipeline_mode<synchronous>, transform_indices = @transform_4, window_bounds = array<i64: 1, 32>}, {pipeline_mode = #tpu.pipeline_mode<synchronous>, transform_indices = @transform_5, window_bounds = array<i64: 32, 16>}, {pipeline_mode = #tpu.pipeline_mode<synchronous>, transform_indices = @transform_6, window_bounds = array<i64: 1, 16>}, {transform_indices = @transform_7, window_bounds = array<i64: 16, 16>}]} {
    %c0 = arith.constant 0 : index
    %c0_0 = arith.constant 0 : index
    %0 = vector.load %arg1[%c0, %c0_0] : memref<16x32xf32, #tpu.memory_space<vmem>>, vector<16x32xf32>
    %c0_1 = arith.constant 0 : index
    %c0_2 = arith.constant 0 : index
    %1 = vector.load %arg2[%c0_1, %c0_2] : memref<32x32xf32, #tpu.memory_space<vmem>>, vector<32x32xf32>
    %cst = arith.constant dense<0.000000e+00> : vector<16x32xf32>
    %2 = tpu.matmul %0, %1, %cst {dimension_numbers = #tpu.dot_dimension_numbers<[1], [0], [0], [1], [0, 0, 1, 1], [], []>} : vector<16x32xf32>, vector<32x32xf32>, vector<16x32xf32> -> vector<16x32xf32>
    %c0_3 = arith.constant 0 : index
    %c0_4 = arith.constant 0 : index
    %3 = vector.load %arg3[%c0_3, %c0_4] : memref<1x32xf32, #tpu.memory_space<vmem>>, vector<1x32xf32>
    %4 = vector.broadcast %3 : vector<1x32xf32> to vector<16x32xf32>
    %5 = arith.addf %2, %4 : vector<16x32xf32>
    %cst_5 = arith.constant 0.000000e+00 : f32
    %6 = vector.broadcast %cst_5 : f32 to vector<16x32xf32>
    %7 = arith.maximumf %5, %6 : vector<16x32xf32>
    %c0_6 = arith.constant 0 : index
    %c0_7 = arith.constant 0 : index
    %8 = vector.load %arg4[%c0_6, %c0_7] : memref<32x32xf32, #tpu.memory_space<vmem>>, vector<32x32xf32>
    %cst_8 = arith.constant dense<0.000000e+00> : vector<16x32xf32>
    %9 = tpu.matmul %7, %8, %cst_8 {dimension_numbers = #tpu.dot_dimension_numbers<[1], [0], [0], [1], [0, 0, 1, 1], [], []>} : vector<16x32xf32>, vector<32x32xf32>, vector<16x32xf32> -> vector<16x32xf32>
    %c0_9 = arith.constant 0 : index
    %c0_10 = arith.constant 0 : index
    %10 = vector.load %arg5[%c0_9, %c0_10] : memref<1x32xf32, #tpu.memory_space<vmem>>, vector<1x32xf32>
    %11 = vector.broadcast %10 : vector<1x32xf32> to vector<16x32xf32>
    %12 = arith.addf %9, %11 : vector<16x32xf32>
    %cst_11 = arith.constant 0.000000e+00 : f32
    %13 = vector.broadcast %cst_11 : f32 to vector<16x32xf32>
    %14 = arith.maximumf %12, %13 : vector<16x32xf32>
    %c0_12 = arith.constant 0 : index
    %c0_13 = arith.constant 0 : index
    %15 = vector.load %arg6[%c0_12, %c0_13] : memref<32x16xf32, #tpu.memory_space<vmem>>, vector<32x16xf32>
    %cst_14 = arith.constant dense<0.000000e+00> : vector<16x16xf32>
    %16 = tpu.matmul %14, %15, %cst_14 {dimension_numbers = #tpu.dot_dimension_numbers<[1], [0], [0], [1], [0, 0, 1, 1], [], []>} : vector<16x32xf32>, vector<32x16xf32>, vector<16x16xf32> -> vector<16x16xf32>
    %c0_15 = arith.constant 0 : index
    %c0_16 = arith.constant 0 : index
    %17 = vector.load %arg7[%c0_15, %c0_16] : memref<1x16xf32, #tpu.memory_space<vmem>>, vector<1x16xf32>
    %18 = vector.broadcast %17 : vector<1x16xf32> to vector<16x16xf32>
    %19 = arith.addf %16, %18 : vector<16x16xf32>
    %c0_17 = arith.constant 0 : index
    %c0_18 = arith.constant 0 : index
    %20 = vector.load %arg8[%c0_17, %c0_18] : memref<16x16xf32, #tpu.memory_space<vmem>>, vector<16x16xf32>
    tpu.vector_store %arg8[%c0_17, %c0_18], %19 {strides = array<i32>} : memref<16x16xf32, #tpu.memory_space<vmem>>, vector<16x16xf32>,
    return
  }
  func.func @transform_0(%arg0: i32) -> (i32, i32) {
    %c0_i32 = arith.constant 0 : i32
    %c0_i32_0 = arith.constant 0 : i32
    return %arg0, %c0_i32 : i32, i32
  }
  func.func @transform_1(%arg0: i32) -> (i32, i32) {
    %c0_i32 = arith.constant 0 : i32
    %c0_i32_0 = arith.constant 0 : i32
    %c0_i32_1 = arith.constant 0 : i32
    return %c0_i32, %c0_i32_0 : i32, i32
  }
  func.func @transform_2(%arg0: i32) -> (i32, i32) {
    %c0_i32 = arith.constant 0 : i32
    %c0_i32_0 = arith.constant 0 : i32
    %c0_i32_1 = arith.constant 0 : i32
    return %c0_i32, %c0_i32_0 : i32, i32
  }
  func.func @transform_3(%arg0: i32) -> (i32, i32) {
    %c0_i32 = arith.constant 0 : i32
    %c0_i32_0 = arith.constant 0 : i32
    %c0_i32_1 = arith.constant 0 : i32
    return %c0_i32, %c0_i32_0 : i32, i32
  }
  func.func @transform_4(%arg0: i32) -> (i32, i32) {
    %c0_i32 = arith.constant 0 : i32
    %c0_i32_0 = arith.constant 0 : i32
    %c0_i32_1 = arith.constant 0 : i32
    return %c0_i32, %c0_i32_0 : i32, i32
  }
  func.func @transform_5(%arg0: i32) -> (i32, i32) {
    %c0_i32 = arith.constant 0 : i32
    %c0_i32_0 = arith.constant 0 : i32
    %c0_i32_1 = arith.constant 0 : i32
    return %c0_i32, %c0_i32_0 : i32, i32
  }
  func.func @transform_6(%arg0: i32) -> (i32, i32) {
    %c0_i32 = arith.constant 0 : i32
    %c0_i32_0 = arith.constant 0 : i32
    %c0_i32_1 = arith.constant 0 : i32
    return %c0_i32, %c0_i32_0 : i32, i32
  }
  func.func @transform_7(%arg0: i32) -> (i32, i32) {
    %c0_i32 = arith.constant 0 : i32
    %c0_i32_0 = arith.constant 0 : i32
    return %arg0, %c0_i32 : i32, i32
  }
}

</mosaic_0001>

<bundles_post_ra>
// kernel: tpu_custom_call.1
= control target key start
LH: loop header
LB: loop body
LE: loop exit
PB: predicated region body
PF: predicated region fallthrough
CT: control target
= control target key end

     0   :  { %12 = vsyncpa [#allocation3], 0  ;;  %s599_s0 = inlined_call_operand.vmem [shape: f32[16,32], index: 0, kind: input, shape index: {}]   ;;  %s600_s1 = inlined_call_operand.vmem [shape: f32[32,32], index: 1, kind: input, shape index: {}]   ;;  %s601_s2 = inlined_call_operand.vmem [shape: f32[1,32], index: 2, kind: input, shape index: {}]   ;;  %s602_s3 = inlined_call_operand.hbm [shape: f32[32,32], index: 3, kind: input, shape index: {}]   ;;  %s603_s4 = inlined_call_operand.vmem [shape: f32[1,32], index: 4, kind: input, shape index: {}]   ;;  %s604_s5 = inlined_call_operand.vmem [shape: f32[32,16], index: 5, kind: input, shape index: {}]   ;;  %s605_s6 = inlined_call_operand.vmem [shape: f32[1,16], index: 6, kind: input, shape index: {}]   ;;  %s606_s7 = inlined_call_operand.hbm [shape: f32[16,16], index: 7, kind: output, shape index: {}]  }
   0x1   :  { %13 = vsyncpa [#allocation4], 0  ;;  %s480_s24 = smov [#allocation2]   ;;  %s432_s28 = scalar_lea.hbm %s602_s3, 512 }
   0x2   :  { %s25_s25 = sshll.u32 %s480_s24, 4  ;;  %p433_p0 = scmp.ne.s32.totalorder %s602_s3, %s432_s28  ;;  %s26_s25 = int_to_ptr.vmem [resolvable:$true] %s25_s25 }
   0x3   :  { %p436_p1 = scmp.lt.u32.totalorder %s432_s28, %s602_s3 }
   0x5   :  { %p438_p2 = pnand %p436_p1, %p433_p0 }
   0x7   :  { %441 = shalt.err (!%p438_p2)
}
   0x8   :  { %s442_s10 = scalar_lea.vmem %s26_s25, 512  ;;  %p447_p4 = scmp.lt.s32.totalorder %s26_s25, %s26_s25 }
   0x9   :  { %p443_p3 = scmp.ne.s32.totalorder %s26_s25, %s442_s10  ;;  %p448_p5 = scmp.lt.s32.totalorder %s442_s10, %s442_s10 }
   0xb   :  { %p449_p6 = por %p448_p5, %p447_p4 }
   0xd   :  { %p450_p7 = pnand %p449_p6, %p443_p3 }
   0xf   :  { %453 = shalt.err (!%p450_p7)
}
  0x10   :  { %s481_s11 = smov 128   ;;  %s482_s12 = smov 8  }
  0x11   :  { %31 = dma.hbm_to_vmem [thread:$0]  %s602_s3, 512, %s26_s25, [#allocation3], %s481_s11, %s481_s11, %s482_s12  }
  0x12   :  { %476 = dma.done.wait [#allocation3], 512  }
  0x13   :  { %477 = vsyncadd [#allocation3], 4294966784  ;;  %vm54_vm0 = vcmask 261120   ;;  %v43_v0 = vld [vmem:[%s600_s1] sm:$0xff]  ;;  %v44_v1 = vld [vmem:[%s600_s1 + $0x8] sm:$0xff]  ;;  %vm324_vm1 = vcmask 130048  }
  0x14   :  { %v45_v2 = vld [vmem:[%s600_s1 + $0x10] sm:$0xff]  ;;  %v404_v3 = vpack.c.bf16 %v44_v1, %v43_v0  ;;  %v46_v4 = vld [vmem:[%s600_s1 + $0x18] sm:$0xff]  ;;  %v41_v5 = vld [vmem:[%s599_s0] sm:$0xff] }
  0x15   :  { %v408_v6 = vpack.c.bf16 %v46_v4, %v45_v2  ;;  %379 = vmatprep.mubr.msk.f32.mxu0 %vm54_vm0, %v41_v5  ;;  %v138_v7 = vld [vmem:[#allocation2] sm:$0xff]  ;;  %v139_v8 = vld [vmem:[#allocation2 + $0x8] sm:$0xff]  ;;  %v140_v11 = vld [vmem:[#allocation2 + $0x10] sm:$0xff] }
  0x16   :  { %405 = vmatprep.subr.bf16.mxu0 %v404_v3  ;;  %v412_v9 = vpack.c.bf16 %v139_v8, %v138_v7  ;;  %v42_v10 = vld [vmem:[%s599_s0 + $0x8] sm:$0xff]  ;;  %v141_v12 = vld [vmem:[#allocation2 + $0x18] sm:$0xff]  ;;  %v232_v14 = vld [vmem:[%s604_s5] sm:$0xff] }
  0x17   :  { %407 = vmatpush3.bf16.msra.mxu0 %v404_v3  ;;  %v416_v13 = vpack.c.bf16 %v141_v12, %v140_v11  ;;  %v233_v15 = vld [vmem:[%s604_s5 + $0x8] sm:$0xff]  ;;  %v344_v17 = vld [vmem:[%s601_s2] ss:$0 sm:$0xff]  ;;  %v234_v24 = vld [vmem:[%s604_s5 + $0x10] sm:$0xff] }
  0x18   :  { %409 = vmatprep.subr.bf16.mxu0 %v408_v6  ;;  %413 = vmatprep.subr.bf16.mxu1 %v412_v9  ;;  %v420_v16 = vpack.c.bf16 %v233_v15, %v232_v14  ;;  %v235_v25 = vld [vmem:[%s604_s5 + $0x18] sm:$0xff]  ;;  %v347_v27 = vld [vmem:[%s603_s4] ss:$0 sm:$0xff]  ;;  %s483_s5 = smov [#allocation5]  }
  0x19   :  { %415 = vmatpush3.bf16.msra.mxu1 %v412_v9  ;;  %v424_v26 = vpack.c.bf16 %v235_v25, %v234_v24  ;;  %v350_v34 = vld [vmem:[%s605_s6] ss:$0 sm:$0xff]  ;;  %s332_s16 = sshll.u32 %s483_s5, 4  ;;  %s333_s16 = int_to_ptr.vmem [resolvable:$true] %s332_s16 }
  0x1a   :  { %417 = vmatprep.subr.bf16.mxu1 %v416_v13  ;;  %s454_s4 = scalar_lea.vmem %s333_s16, 256  ;;  %p459_p9 = scmp.lt.s32.totalorder %s333_s16, %s333_s16 }
  0x1b   :  { %411 = vmatpush3.bf16.msra.mxu0 %v408_v6  ;;  %p455_p8 = scmp.ne.s32.totalorder %s333_s16, %s454_s4  ;;  %p460_p10 = scmp.lt.s32.totalorder %s454_s4, %s454_s4 }
  0x1c   :  { %421 = vmatprep.subr.bf16.mxu0 %v420_v16 }
  0x1d   :  { %419 = vmatpush3.bf16.msra.mxu1 %v416_v13  ;;  %p461_p11 = por %p460_p10, %p459_p9 }
  0x1e   :  { %380 = vmatmul.mubr.msk.f32.vlgmr.msra.gmra.mrb[0].mxu0 %vm54_vm0, %v42_v10 }
  0x1f   :  { %423 = vmatpush3.bf16.msra.mxu0 %v420_v16  ;;  %p462_p12 = pnand %p461_p11, %p455_p8 }
  0x20   :  { %425 = vmatprep.subr.bf16.mxu0 %v424_v26 }
  0x23   :  { %427 = vmatpush3.bf16.msra.mxu0 %v424_v26 }
  0xf1   :  { %v381_v18 = vpop.f32.mrb[0].mxu0 }
  0xf2   :  { %v133_v19 = vadd.f32 %v381_v18, %v344_v17  ;;  %v127_v20 = vpop.f32.mrb[1].mxu0 }
  0xf3   :  { %v128_v21 = vadd.f32 %v344_v17, %v127_v20 }
  0xf4   :  { %v137_v23 = vmax.f32 %v133_v19, 0.0 }
  0xf5   :  { %v136_v22 = vmax.f32 %v128_v21, 0.0 }
  0xf7   :  { %390 = vmatprep.mubr.msk.f32.mxu1 %vm54_vm0, %v136_v22 }
  0xf8   :  { %391 = vmatmul.mubr.msk.f32.vlgmr.msra.gmra.mrb[0].mxu1 %vm54_vm0, %v137_v23 }
 0x1cb   :  { %v392_v28 = vpop.f32.mrb[0].mxu1 }
 0x1cc   :  { %v227_v29 = vadd.f32 %v392_v28, %v347_v27  ;;  %v221_v30 = vpop.f32.mrb[1].mxu1 }
 0x1cd   :  { %v222_v31 = vadd.f32 %v347_v27, %v221_v30 }
 0x1ce   :  { %v231_v33 = vmax.f32 %v227_v29, 0.0 }
 0x1cf   :  { %v230_v32 = vmax.f32 %v222_v31, 0.0 }
 0x1d1   :  { %401 = vmatprep.mubr.msk.f32.mxu0 %vm54_vm0, %v230_v32 }
 0x1d2   :  { %402 = vmatmul.mubr.msk.f32.vlgmr.msra.gmra.mrb[2].mxu0 %vm54_vm0, %v231_v33 }
 0x2a5   :  { %v403_v35 = vpop.f32.mrb[2].mxu0 }
 0x2a6   :  { %v321_v36 = vadd.f32 %v403_v35, %v350_v34  ;;  %v315_v37 = vpop.f32.mrb[3].mxu0 }
 0x2a7   :  { %v316_v38 = vadd.f32 %v350_v34, %v315_v37 }
 0x2a8   :  { %326 = vst.msk [vmem:[#allocation5 + $0x8] sm:$0xff] %vm324_vm1, %v321_v36 }
 0x2a9   :  { %325 = vst.msk [vmem:[#allocation5] sm:$0xff] %vm324_vm1, %v316_v38 }
 0x2aa   :  { %465 = shalt.err (!%p462_p12)
}
 0x2ab   :  { %s466_s6 = scalar_lea.hbm %s606_s7, 256 }
 0x2ac   :  { %p467_p13 = scmp.ne.s32.totalorder %s606_s7, %s466_s6  ;;  %p470_p0 = scmp.lt.u32.totalorder %s466_s6, %s606_s7 }
 0x2ae   :  { %p472_p1 = pnand %p470_p0, %p467_p13 }
 0x2b0   :  { %475 = shalt.err (!%p472_p1)
}
 0x2b1   :  { %338 = dma.vmem_to_hbm [thread:$0]  %s333_s16, 256, %s606_s7, [#allocation4], %s481_s11, %s481_s11, %s482_s12  }
 0x2b2   :  { %478 = dma.done.wait [#allocation4], 256  }
 0x2b3   :  { %479 = vsyncadd [#allocation4], 4294967040 }
 0x2b4   :  { %342 = vsyncpa [#allocation3], 1 }
 0x2b5   :  { %343 = vsyncpa [#allocation4], 1 }

// kernel: tpu_custom_call.1
= control target key start
LH: loop header
LB: loop body
LE: loop exit
PB: predicated region body
PF: predicated region fallthrough
CT: control target
= control target key end

     0   :  { %12 = vsyncpa [#allocation3], 0  ;;  %s599_s0 = inlined_call_operand.vmem [shape: f32[16,32], index: 0, kind: input, shape index: {}]   ;;  %s600_s1 = inlined_call_operand.vmem [shape: f32[32,32], index: 1, kind: input, shape index: {}]   ;;  %s601_s2 = inlined_call_operand.vmem [shape: f32[1,32], index: 2, kind: input, shape index: {}]   ;;  %s602_s3 = inlined_call_operand.hbm [shape: f32[32,32], index: 3, kind: input, shape index: {}]   ;;  %s603_s4 = inlined_call_operand.vmem [shape: f32[1,32], index: 4, kind: input, shape index: {}]   ;;  %s604_s5 = inlined_call_operand.vmem [shape: f32[32,16], index: 5, kind: input, shape index: {}]   ;;  %s605_s6 = inlined_call_operand.vmem [shape: f32[1,16], index: 6, kind: input, shape index: {}]   ;;  %s606_s7 = inlined_call_operand.hbm [shape: f32[16,16], index: 7, kind: output, shape index: {}]  }
   0x1   :  { %13 = vsyncpa [#allocation4], 0  ;;  %s480_s24 = smov [#allocation2]   ;;  %s432_s28 = scalar_lea.hbm %s602_s3, 512 }
   0x2   :  { %s25_s25 = sshll.u32 %s480_s24, 4  ;;  %p433_p0 = scmp.ne.s32.totalorder %s602_s3, %s432_s28  ;;  %s26_s25 = int_to_ptr.vmem [resolvable:$true] %s25_s25 }
   0x3   :  { %p436_p1 = scmp.lt.u32.totalorder %s432_s28, %s602_s3 }
   0x5   :  { %p438_p2 = pnand %p436_p1, %p433_p0 }
   0x7   :  { %441 = shalt.err (!%p438_p2)
}
   0x8   :  { %s442_s10 = scalar_lea.vmem %s26_s25, 512  ;;  %p447_p4 = scmp.lt.s32.totalorder %s26_s25, %s26_s25 }
   0x9   :  { %p443_p3 = scmp.ne.s32.totalorder %s26_s25, %s442_s10  ;;  %p448_p5 = scmp.lt.s32.totalorder %s442_s10, %s442_s10 }
   0xb   :  { %p449_p6 = por %p448_p5, %p447_p4 }
   0xd   :  { %p450_p7 = pnand %p449_p6, %p443_p3 }
   0xf   :  { %453 = shalt.err (!%p450_p7)
}
  0x10   :  { %s481_s11 = smov 128   ;;  %s482_s12 = smov 8  }
  0x11   :  { %31 = dma.hbm_to_vmem [thread:$0]  %s602_s3, 512, %s26_s25, [#allocation3], %s481_s11, %s481_s11, %s482_s12  }
  0x12   :  { %476 = dma.done.wait [#allocation3], 512  }
  0x13   :  { %477 = vsyncadd [#allocation3], 4294966784  ;;  %vm54_vm0 = vcmask 261120   ;;  %v43_v0 = vld [vmem:[%s600_s1] sm:$0xff]  ;;  %v44_v1 = vld [vmem:[%s600_s1 + $0x8] sm:$0xff]  ;;  %vm324_vm1 = vcmask 130048  }
  0x14   :  { %v45_v2 = vld [vmem:[%s600_s1 + $0x10] sm:$0xff]  ;;  %v404_v3 = vpack.c.bf16 %v44_v1, %v43_v0  ;;  %v46_v4 = vld [vmem:[%s600_s1 + $0x18] sm:$0xff]  ;;  %v41_v5 = vld [vmem:[%s599_s0] sm:$0xff] }
  0x15   :  { %v408_v6 = vpack.c.bf16 %v46_v4, %v45_v2  ;;  %379 = vmatprep.mubr.msk.f32.mxu0 %vm54_vm0, %v41_v5  ;;  %v138_v7 = vld [vmem:[#allocation2] sm:$0xff]  ;;  %v139_v8 = vld [vmem:[#allocation2 + $0x8] sm:$0xff]  ;;  %v140_v11 = vld [vmem:[#allocation2 + $0x10] sm:$0xff] }
  0x16   :  { %405 = vmatprep.subr.bf16.mxu0 %v404_v3  ;;  %v412_v9 = vpack.c.bf16 %v139_v8, %v138_v7  ;;  %v42_v10 = vld [vmem:[%s599_s0 + $0x8] sm:$0xff]  ;;  %v141_v12 = vld [vmem:[#allocation2 + $0x18] sm:$0xff]  ;;  %v232_v14 = vld [vmem:[%s604_s5] sm:$0xff] }
  0x17   :  { %407 = vmatpush3.bf16.msra.mxu0 %v404_v3  ;;  %v416_v13 = vpack.c.bf16 %v141_v12, %v140_v11  ;;  %v233_v15 = vld [vmem:[%s604_s5 + $0x8] sm:$0xff]  ;;  %v344_v17 = vld [vmem:[%s601_s2] ss:$0 sm:$0xff]  ;;  %v234_v24 = vld [vmem:[%s604_s5 + $0x10] sm:$0xff] }
  0x18   :  { %409 = vmatprep.subr.bf16.mxu0 %v408_v6  ;;  %413 = vmatprep.subr.bf16.mxu1 %v412_v9  ;;  %v420_v16 = vpack.c.bf16 %v233_v15, %v232_v14  ;;  %v235_v25 = vld [vmem:[%s604_s5 + $0x18] sm:$0xff]  ;;  %v347_v27 = vld [vmem:[%s603_s4] ss:$0 sm:$0xff]  ;;  %s483_s5 = smov [#allocation5]  }
  0x19   :  { %415 = vmatpush3.bf16.msra.mxu1 %v412_v9  ;;  %v424_v26 = vpack.c.bf16 %v235_v25, %v234_v24  ;;  %v350_v34 = vld [vmem:[%s605_s6] ss:$0 sm:$0xff]  ;;  %s332_s16 = sshll.u32 %s483_s5, 4  ;;  %s333_s16 = int_to_ptr.vmem [resolvable:$true] %s332_s16 }
  0x1a   :  { %417 = vmatprep.subr.bf16.mxu1 %v416_v13  ;;  %s454_s4 = scalar_lea.vmem %s333_s16, 256  ;;  %p459_p9 = scmp.lt.s32.totalorder %s333_s16, %s333_s16 }
  0x1b   :  { %411 = vmatpush3.bf16.msra.mxu0 %v408_v6  ;;  %p455_p8 = scmp.ne.s32.totalorder %s333_s16, %s454_s4  ;;  %p460_p10 = scmp.lt.s32.totalorder %s454_s4, %s454_s4 }
  0x1c   :  { %421 = vmatprep.subr.bf16.mxu0 %v420_v16 }
  0x1d   :  { %419 = vmatpush3.bf16.msra.mxu1 %v416_v13  ;;  %p461_p11 = por %p460_p10, %p459_p9 }
  0x1e   :  { %380 = vmatmul.mubr.msk.f32.vlgmr.msra.gmra.mrb[0].mxu0 %vm54_vm0, %v42_v10 }
  0x1f   :  { %423 = vmatpush3.bf16.msra.mxu0 %v420_v16  ;;  %p462_p12 = pnand %p461_p11, %p455_p8 }
  0x20   :  { %425 = vmatprep.subr.bf16.mxu0 %v424_v26 }
  0x23   :  { %427 = vmatpush3.bf16.msra.mxu0 %v424_v26 }
  0xf1   :  { %v381_v18 = vpop.f32.mrb[0].mxu0 }
  0xf2   :  { %v133_v19 = vadd.f32 %v381_v18, %v344_v17  ;;  %v127_v20 = vpop.f32.mrb[1].mxu0 }
  0xf3   :  { %v128_v21 = vadd.f32 %v344_v17, %v127_v20 }
  0xf4   :  { %v137_v23 = vmax.f32 %v133_v19, 0.0 }
  0xf5   :  { %v136_v22 = vmax.f32 %v128_v21, 0.0 }
  0xf7   :  { %390 = vmatprep.mubr.msk.f32.mxu1 %vm54_vm0, %v136_v22 }
  0xf8   :  { %391 = vmatmul.mubr.msk.f32.vlgmr.msra.gmra.mrb[0].mxu1 %vm54_vm0, %v137_v23 }
 0x1cb   :  { %v392_v28 = vpop.f32.mrb[0].mxu1 }
 0x1cc   :  { %v227_v29 = vadd.f32 %v392_v28, %v347_v27  ;;  %v221_v30 = vpop.f32.mrb[1].mxu1 }
 0x1cd   :  { %v222_v31 = vadd.f32 %v347_v27, %v221_v30 }
 0x1ce   :  { %v231_v33 = vmax.f32 %v227_v29, 0.0 }
 0x1cf   :  { %v230_v32 = vmax.f32 %v222_v31, 0.0 }
 0x1d1   :  { %401 = vmatprep.mubr.msk.f32.mxu0 %vm54_vm0, %v230_v32 }
 0x1d2   :  { %402 = vmatmul.mubr.msk.f32.vlgmr.msra.gmra.mrb[2].mxu0 %vm54_vm0, %v231_v33 }
 0x2a5   :  { %v403_v35 = vpop.f32.mrb[2].mxu0 }
 0x2a6   :  { %v321_v36 = vadd.f32 %v403_v35, %v350_v34  ;;  %v315_v37 = vpop.f32.mrb[3].mxu0 }
 0x2a7   :  { %v316_v38 = vadd.f32 %v350_v34, %v315_v37 }
 0x2a8   :  { %326 = vst.msk [vmem:[#allocation5 + $0x8] sm:$0xff] %vm324_vm1, %v321_v36 }
 0x2a9   :  { %325 = vst.msk [vmem:[#allocation5] sm:$0xff] %vm324_vm1, %v316_v38 }
 0x2aa   :  { %465 = shalt.err (!%p462_p12)
}
 0x2ab   :  { %s466_s6 = scalar_lea.hbm %s606_s7, 256 }
 0x2ac   :  { %p467_p13 = scmp.ne.s32.totalorder %s606_s7, %s466_s6  ;;  %p470_p0 = scmp.lt.u32.totalorder %s466_s6, %s606_s7 }
 0x2ae   :  { %p472_p1 = pnand %p470_p0, %p467_p13 }
 0x2b0   :  { %475 = shalt.err (!%p472_p1)
}
 0x2b1   :  { %338 = dma.vmem_to_hbm [thread:$0]  %s333_s16, 256, %s606_s7, [#allocation4], %s481_s11, %s481_s11, %s482_s12  }
 0x2b2   :  { %478 = dma.done.wait [#allocation4], 256  }
 0x2b3   :  { %479 = vsyncadd [#allocation4], 4294967040 }
 0x2b4   :  { %342 = vsyncpa [#allocation3], 1 }
 0x2b5   :  { %343 = vsyncpa [#allocation4], 1 }

</bundles_post_ra>
